<compile_context>
chip_gen: v7x
topology: tpu7x:2x2x1
jax: 0.10.0
libtpu: 0.0.40
codegen_flags: <defaults>
</compile_context>

<pallas_src>
import functools

import jax
import jax.numpy as jnp
from jax.experimental import pallas as pl
from jax.experimental.pallas import tpu as pltpu


# ----------------------------------------------------------------------------- kernels
def _pfn_kernel_paired(x_ref, w_ref, b_ref, out_ref, *, points, last_vfe):
    """Point-pair packed kernel (points % 16 == 0): lane-dense 128-wide output rows.

    x_ref:   (tn*P//2, 2*C_in)   row = [x(pillar, 2q), x(pillar, 2q+1)]
    w_ref:   (2*C_in, 2*C_half)  block-diagonal diag(W, W), BN scale folded in
    b_ref:   (1, 2*C_half)       [bias, bias] (folded BN shift / linear bias)
    out_ref: (tn*P//2, 4*C_half) row = [y(2q), y_max, y(2q+1), y_max]   (not last layer)
             (tn, C_half)        per-pillar max                          (last layer)
    """
    rows2, _ = x_ref.shape
    c2 = w_ref.shape[1]                    # 2 * C_half
    chalf = c2 // 2
    p2 = points // 2
    tn = rows2 // p2

    # Linear on the MXU (BN scale already folded into w); accumulate in f32.
    y = jnp.dot(x_ref[...], w_ref[...], preferred_element_type=jnp.float32)
    # Folded BN shift + ReLU on the VPU.
    y = jnp.maximum(y + b_ref[...], 0.0)                  # (rows2, 2*chalf) = [y_even|y_odd]

    # Max over a pillar's points: rows within the pillar, then the even/odd lane halves.
    # Leading-dim split only (p2 is a multiple of 8) -> pure layout.
    m = jnp.max(y.reshape(tn, p2, c2), axis=1)            # (tn, 2*chalf)
    y_max = jnp.maximum(m[:, :chalf], m[:, chalf:])       # (tn, chalf)

    if last_vfe:
        out_ref[...] = y_max.astype(out_ref.dtype)
        return

    y_rep = jnp.broadcast_to(y_max[:, None, :], (tn, p2, chalf)).reshape(rows2, chalf)
    y_rep = y_rep.astype(out_ref.dtype)
    yc = y.astype(out_ref.dtype)
    # Direct sliced stores (no concat temporary); the 128-lane block DMAs out lane-dense.
    out_ref[:, 0 * chalf:1 * chalf] = yc[:, :chalf]
    out_ref[:, 1 * chalf:2 * chalf] = y_rep
    out_ref[:, 2 * chalf:3 * chalf] = yc[:, chalf:]
    out_ref[:, 3 * chalf:4 * chalf] = y_rep


def _pfn_kernel_rowwise(x_ref, w_ref, b_ref, out_ref, *, points, last_vfe):
    """Fallback kernel (points % 8 == 0 but not 16): one point per row, 2*C_half output."""
    rows, _ = x_ref.shape
    chalf = w_ref.shape[1]
    tn = rows // points

    y = jnp.dot(x_ref[...], w_ref[...], preferred_element_type=jnp.float32)
    y = jnp.maximum(y + b_ref[...], 0.0)                   # (rows, chalf)
    y_max = jnp.max(y.reshape(tn, points, chalf), axis=1)  # (tn, chalf)

    if last_vfe:
        out_ref[...] = y_max.astype(out_ref.dtype)
        return

    y_rep = jnp.broadcast_to(y_max[:, None, :], (tn, points, chalf)).reshape(rows, chalf)
    out_ref[:, :chalf] = y.astype(out_ref.dtype)
    out_ref[:, chalf:] = y_rep.astype(out_ref.dtype)


# ----------------------------------------------------------------------------- wrapper
def _padded_block_bytes(rows, cols, dtype):
    """VMEM footprint of a (rows, cols) block after (8, 128) tile padding."""
    rows_p = -(-rows // 8) * 8
    cols_p = -(-cols // 128) * 128
    return rows_p * cols_p * jnp.dtype(dtype).itemsize


def _pfn_xla(inputs, w_fused, bias, last_vfe):
    """Plain-XLA fallback for unaligned points-per-pillar."""
    y = jnp.einsum("npc,ch->nph", inputs, w_fused) + bias.reshape(1, 1, -1)
    y = jnp.maximum(y, 0.0)
    y_max = jnp.max(y, axis=1, keepdims=True)
    if last_vfe:
        return y_max
    return jnp.concatenate([y, jnp.broadcast_to(y_max, y.shape)], axis=-1)


def pfn_layer(inputs, weight_t, scale, bias, *, last_vfe=False, tn=None, out_dtype=None,
              target_points_per_tile=16384, vmem_budget_bytes=40 * 1024 * 1024):
    """PFNLayer forward (eval-mode BatchNorm folded into scale/bias).

    inputs:   (N, P, C_in) float32
    weight_t: (C_in, C_half)          transposed nn.Linear weight
    scale:    (C_half,)               folded BN scale (ones if use_norm=False)
    bias:     (C_half,)               folded BN shift (or linear bias)
    tn:       pillars per grid step (None = auto from target_points_per_tile & VMEM budget)
    out_dtype: output dtype (None = same as inputs; jnp.bfloat16 halves HBM write traffic)
    """
    n, p, cin = inputs.shape
    chalf = weight_t.shape[1]
    out_dtype = inputs.dtype if out_dtype is None else jnp.dtype(out_dtype)

    # Fold the per-channel BN scale into the weight: (x @ W)*s + b == x @ (W*s) + b.
    scale = jnp.asarray(scale, jnp.float32).reshape(1, chalf)
    bias = jnp.asarray(bias, jnp.float32).reshape(1, chalf)
    w_fused = weight_t.astype(jnp.float32) * scale

    # Choose the kernel variant from the points-per-pillar alignment.
    if p % 16 == 0:
        mode = "paired"
    elif p % 8 == 0:
        mode = "rowwise"
    else:
        # TODO(synk): unaligned P has no clean (8,128) in-kernel reduction; use XLA.
        out = _pfn_xla(inputs, w_fused, bias, last_vfe).astype(out_dtype)
        return out

    # ---- pillar tile size, sized against the *lane-padded* VMEM footprint ----
    if tn is None:
        tn = max(1, target_points_per_tile // p)
    tn = max(1, min(int(tn), n))
    if tn < n:
        tn = min(n, max(16, (tn // 16) * 16))   # sublane alignment (incl. bf16 outputs)

    def _vmem_estimate(t):
        if mode == "paired":
            r = t * (p // 2)
            in_b = _padded_block_bytes(r, 2 * cin, inputs.dtype)
            out_b = (_padded_block_bytes(t, chalf, out_dtype) if last_vfe
                     else _padded_block_bytes(r, 4 * chalf, out_dtype))
            tmp_b = 4 * _padded_block_bytes(r, 2 * chalf, jnp.float32)
        else:
            r = t * p
            in_b = _padded_block_bytes(r, cin, inputs.dtype)
            out_b = (_padded_block_bytes(t, chalf, out_dtype) if last_vfe
                     else _padded_block_bytes(r, 2 * chalf, out_dtype))
            tmp_b = 4 * _padded_block_bytes(r, chalf, jnp.float32)
        return 2 * (in_b + out_b) + tmp_b + (2 << 20)      # x2: double-buffered blocks

    while tn > 16 and _vmem_estimate(tn) > vmem_budget_bytes:
        tn = max(16, (tn // 2 // 16) * 16)

    num_tiles = pl.cdiv(n, tn)
    n_pad = num_tiles * tn
    if n_pad != n:
        inputs = jnp.pad(inputs, ((0, n_pad - n), (0, 0), (0, 0)))

    vmem_limit = min(100 * 1024 * 1024,
                     max(32 * 1024 * 1024, int(_vmem_estimate(tn) * 1.25)))
    cparams = pltpu.CompilerParams(
        dimension_semantics=("parallel",),          # shard pillar tiles across TCs
        vmem_limit_bytes=vmem_limit,
    )

    if mode == "paired":
        p2 = p // 2
        x2d = inputs.reshape(n_pad * p2, 2 * cin)   # free reshape on contiguous memory
        # Block-diagonal fused weight: [x_even, x_odd] @ diag(W, W) = [y_even, y_odd].
        w2 = jnp.zeros((2 * cin, 2 * chalf), jnp.float32)
        w2 = w2.at[:cin, :chalf].set(w_fused).at[cin:, chalf:].set(w_fused)
        b2 = jnp.concatenate([bias, bias], axis=-1)

        if last_vfe:
            out_shape = jax.ShapeDtypeStruct((n_pad, chalf), out_dtype)
            out_specs = pl.BlockSpec((tn, chalf), lambda i: (i, 0))
        else:
            out_shape = jax.ShapeDtypeStruct((n_pad * p2, 4 * chalf), out_dtype)
            out_specs = pl.BlockSpec((tn * p2, 4 * chalf), lambda i: (i, 0))

        kernel = functools.partial(_pfn_kernel_paired, points=p, last_vfe=last_vfe)
        in_specs = [
            pl.BlockSpec((tn * p2, 2 * cin), lambda i: (i, 0)),    # pillar tile, pipelined
            pl.BlockSpec((2 * cin, 2 * chalf), lambda i: (0, 0)),  # fused weight, resident
            pl.BlockSpec((1, 2 * chalf), lambda i: (0, 0)),        # fused bias, resident
        ]
        args = (x2d, w2, b2)
    else:  # rowwise
        x2d = inputs.reshape(n_pad * p, cin)
        if last_vfe:
            out_shape = jax.ShapeDtypeStruct((n_pad, chalf), out_dtype)
            out_specs = pl.BlockSpec((tn, chalf), lambda i: (i, 0))
        else:
            out_shape = jax.ShapeDtypeStruct((n_pad * p, 2 * chalf), out_dtype)
            out_specs = pl.BlockSpec((tn * p, 2 * chalf), lambda i: (i, 0))

        kernel = functools.partial(_pfn_kernel_rowwise, points=p, last_vfe=last_vfe)
        in_specs = [
            pl.BlockSpec((tn * p, cin), lambda i: (i, 0)),
            pl.BlockSpec((cin, chalf), lambda i: (0, 0)),
            pl.BlockSpec((1, chalf), lambda i: (0, 0)),
        ]
        args = (x2d, w_fused, bias)

    out2d = pl.pallas_call(
        kernel,
        out_shape=out_shape,
        grid=(num_tiles,),
        in_specs=in_specs,
        out_specs=out_specs,
        compiler_params=cparams,
    )(*args)

    if last_vfe:
        return out2d[:n].reshape(n, 1, chalf)
    if mode == "paired":
        return out2d[: n * (p // 2)].reshape(n, p, 2 * chalf)
    return out2d[: n * p].reshape(n, p, 2 * chalf)


# ---------------------------------------------------------------------------- reference
def _ref_pfn(inputs, weight_t, scale, bias, last_vfe):
    """Pure-JAX reference of the (eval-mode) PFNLayer forward."""
    x = jnp.einsum("npc,ch->nph", inputs, weight_t)
    x = x * scale.reshape(1, 1, -1) + bias.reshape(1, 1, -1)
    x = jnp.maximum(x, 0.0)
    x_max = jnp.max(x, axis=1, keepdims=True)
    if last_vfe:
        return x_max
    return jnp.concatenate([x, jnp.broadcast_to(x_max, x.shape)], axis=-1)


if __name__ == "__main__":
    # Module config: in_channels=16, out_channels=64, use_norm=True
    #   -> linear maps 16 -> 32 (out_channels // 2); concat output has 64 channels.
    N, P, C_IN, C_OUT = 20, 32, 16, 64
    C_HALF = C_OUT // 2
    EPS = 0.001

    key = jax.random.PRNGKey(0)
    k_x, k_w, k_g, k_b, k_m, k_v = jax.random.split(key, 6)

    inputs = jax.random.normal(k_x, (N, P, C_IN), dtype=jnp.float32)

    # nn.Linear(16, 32, bias=False): weight (C_HALF, C_IN); store transposed.
    lin_w = jax.random.normal(k_w, (C_HALF, C_IN), dtype=jnp.float32) * (1.0 / C_IN ** 0.5)
    weight_t = lin_w.T

    # BatchNorm1d(32, eps=0.001) params / running stats (synthetic, deterministic).
    gamma = 1.0 + 0.1 * jax.random.normal(k_g, (C_HALF,), dtype=jnp.float32)
    beta = 0.1 * jax.random.normal(k_b, (C_HALF,), dtype=jnp.float32)
    running_mean = 0.1 * jax.random.normal(k_m, (C_HALF,), dtype=jnp.float32)
    running_var = jnp.abs(1.0 + 0.1 * jax.random.normal(k_v, (C_HALF,), dtype=jnp.float32))

    inv_std = 1.0 / jnp.sqrt(running_var + EPS)
    bn_scale = gamma * inv_std
    bn_bias = beta - running_mean * gamma * inv_std

    # 1) non-last layer, paired lane-dense path, multi-tile with pillar padding.
    out = pfn_layer(inputs, weight_t, bn_scale, bn_bias, last_vfe=False, tn=16)
    out = jax.block_until_ready(out)
    ref = _ref_pfn(inputs, weight_t, bn_scale, bn_bias, last_vfe=False)
    assert out.shape == (N, P, C_OUT), out.shape
    assert jnp.allclose(out, ref, atol=1e-5, rtol=1e-5), "mismatch (paired concat)"

    # 2) last-layer path (default tn -> single full tile).
    out_last = pfn_layer(inputs, weight_t, bn_scale, bn_bias, last_vfe=True)
    out_last = jax.block_until_ready(out_last)
    ref_last = _ref_pfn(inputs, weight_t, bn_scale, bn_bias, last_vfe=True)
    assert out_last.shape == (N, 1, C_HALF), out_last.shape
    assert jnp.allclose(out_last, ref_last, atol=1e-5, rtol=1e-5), "mismatch (last)"

    # 3) P multiple of 8 but not 16 -> row-wise fallback kernel.
    P24 = 24
    inputs_24 = inputs[:, :P24, :]
    out_24 = pfn_layer(inputs_24, weight_t, bn_scale, bn_bias, last_vfe=False, tn=16)
    out_24 = jax.block_until_ready(out_24)
    ref_24 = _ref_pfn(inputs_24, weight_t, bn_scale, bn_bias, last_vfe=False)
    assert out_24.shape == (N, P24, C_OUT), out_24.shape
    assert jnp.allclose(out_24, ref_24, atol=1e-5, rtol=1e-5), "mismatch (rowwise concat)"

    # 4) unaligned P -> XLA fallback (correctness only).
    P7 = 7
    inputs_7 = inputs[:, :P7, :]
    out_7 = jax.block_until_ready(
        pfn_layer(inputs_7, weight_t, bn_scale, bn_bias, last_vfe=False))
    ref_7 = _ref_pfn(inputs_7, weight_t, bn_scale, bn_bias, last_vfe=False)
    assert jnp.allclose(out_7, ref_7, atol=1e-5, rtol=1e-5), "mismatch (xla fallback)"

    # 5) bf16 output (halves the dominant HBM write); matmul accumulation stays f32.
    out_bf16 = pfn_layer(inputs, weight_t, bn_scale, bn_bias, last_vfe=False, tn=16,
                         out_dtype=jnp.bfloat16)
    out_bf16 = jax.block_until_ready(out_bf16)
    assert out_bf16.dtype == jnp.bfloat16
    assert jnp.allclose(out_bf16.astype(jnp.float32), ref, atol=5e-2, rtol=5e-2), \
        "mismatch (bf16)"

    print("KERNEL_OK")
</pallas_src>

<mosaic_0001>
module attributes {stable_mosaic.version = 11 : i64} {
  func.func @_pfn_kernel_paired(%arg0: i32, %arg1: memref<256x32xf32, #tpu.memory_space<vmem>>, %arg2: memref<32x64xf32, #tpu.memory_space<vmem>>, %arg3: memref<1x64xf32, #tpu.memory_space<vmem>>, %arg4: memref<256x128xf32, #tpu.memory_space<vmem>>) attributes {dimension_semantics = [#tpu.dimension_semantics<parallel>], iteration_bounds = array<i64: 2>, scalar_prefetch = 0 : i64, scratch_operands = 0 : i64, tpu.core_type = #tpu.core_type<tc>, window_params = [{transform_indices = @transform_0, window_bounds = array<i64: 256, 32>}, {pipeline_mode = #tpu.pipeline_mode<synchronous>, transform_indices = @transform_1, window_bounds = array<i64: 32, 64>}, {pipeline_mode = #tpu.pipeline_mode<synchronous>, transform_indices = @transform_2, window_bounds = array<i64: 1, 64>}, {transform_indices = @transform_3, window_bounds = array<i64: 256, 128>}]} {
    %c0 = arith.constant 0 : index
    %c0_0 = arith.constant 0 : index
    %0 = vector.load %arg1[%c0, %c0_0] : memref<256x32xf32, #tpu.memory_space<vmem>>, vector<256x32xf32>
    %c0_1 = arith.constant 0 : index
    %c0_2 = arith.constant 0 : index
    %1 = vector.load %arg2[%c0_1, %c0_2] : memref<32x64xf32, #tpu.memory_space<vmem>>, vector<32x64xf32>
    %cst = arith.constant dense<0.000000e+00> : vector<256x64xf32>
    %2 = tpu.matmul %0, %1, %cst {dimension_numbers = #tpu.dot_dimension_numbers<[1], [0], [0], [1], [0, 0, 1, 1], [], []>} : vector<256x32xf32>, vector<32x64xf32>, vector<256x64xf32> -> vector<256x64xf32>
    %c0_3 = arith.constant 0 : index
    %c0_4 = arith.constant 0 : index
    %3 = vector.load %arg3[%c0_3, %c0_4] : memref<1x64xf32, #tpu.memory_space<vmem>>, vector<1x64xf32>
    %4 = vector.broadcast %3 : vector<1x64xf32> to vector<256x64xf32>
    %5 = arith.addf %2, %4 : vector<256x64xf32>
    %cst_5 = arith.constant 0.000000e+00 : f32
    %6 = vector.broadcast %cst_5 : f32 to vector<256x64xf32>
    %7 = arith.maximumf %5, %6 : vector<256x64xf32>
    %8 = vector.shape_cast %7 : vector<256x64xf32> to vector<16x16x64xf32>
    %cst_6 = arith.constant dense<0xFF800000> : vector<16x64xf32>
    %9 = vector.multi_reduction <maximumf>, %8, %cst_6 [1] : vector<16x16x64xf32> to vector<16x64xf32>
    %10 = vector.extract_strided_slice %9 {offsets = [0, 0], sizes = [16, 32], strides = [1, 1]} : vector<16x64xf32> to vector<16x32xf32>
    %11 = vector.extract_strided_slice %9 {offsets = [0, 32], sizes = [16, 32], strides = [1, 1]} : vector<16x64xf32> to vector<16x32xf32>
    %12 = arith.maximumf %10, %11 : vector<16x32xf32>
    %13 = vector.shape_cast %12 : vector<16x32xf32> to vector<16x1x32xf32>
    %14 = vector.shape_cast %13 : vector<16x1x32xf32> to vector<16x1x32xf32>
    %15 = vector.broadcast %14 : vector<16x1x32xf32> to vector<16x16x32xf32>
    %16 = vector.shape_cast %15 : vector<16x16x32xf32> to vector<256x32xf32>
    %17 = vector.extract_strided_slice %7 {offsets = [0, 0], sizes = [256, 32], strides = [1, 1]} : vector<256x64xf32> to vector<256x32xf32>
    %c0_7 = arith.constant 0 : index
    %c0_8 = arith.constant 0 : index
    %18 = vector.load %arg4[%c0_7, %c0_8] : memref<256x128xf32, #tpu.memory_space<vmem>>, vector<256x32xf32>
    tpu.vector_store %arg4[%c0_7, %c0_8], %17 {strides = array<i32>} : memref<256x128xf32, #tpu.memory_space<vmem>>, vector<256x32xf32>,
    %c0_9 = arith.constant 0 : index
    %c32 = arith.constant 32 : index
    %19 = vector.load %arg4[%c0_9, %c32] : memref<256x128xf32, #tpu.memory_space<vmem>>, vector<256x32xf32>
    tpu.vector_store %arg4[%c0_9, %c32], %16 {strides = array<i32>} : memref<256x128xf32, #tpu.memory_space<vmem>>, vector<256x32xf32>,
    %20 = vector.extract_strided_slice %7 {offsets = [0, 32], sizes = [256, 32], strides = [1, 1]} : vector<256x64xf32> to vector<256x32xf32>
    %c0_10 = arith.constant 0 : index
    %c64 = arith.constant 64 : index
    %21 = vector.load %arg4[%c0_10, %c64] : memref<256x128xf32, #tpu.memory_space<vmem>>, vector<256x32xf32>
    tpu.vector_store %arg4[%c0_10, %c64], %20 {strides = array<i32>} : memref<256x128xf32, #tpu.memory_space<vmem>>, vector<256x32xf32>,
    %c0_11 = arith.constant 0 : index
    %c96 = arith.constant 96 : index
    %22 = vector.load %arg4[%c0_11, %c96] : memref<256x128xf32, #tpu.memory_space<vmem>>, vector<256x32xf32>
    tpu.vector_store %arg4[%c0_11, %c96], %16 {strides = array<i32>} : memref<256x128xf32, #tpu.memory_space<vmem>>, vector<256x32xf32>,
    return
  }
  func.func @transform_0(%arg0: i32) -> (i32, i32) {
    %c0_i32 = arith.constant 0 : i32
    %c0_i32_0 = arith.constant 0 : i32
    return %arg0, %c0_i32 : i32, i32
  }
  func.func @transform_1(%arg0: i32) -> (i32, i32) {
    %c0_i32 = arith.constant 0 : i32
    %c0_i32_0 = arith.constant 0 : i32
    %c0_i32_1 = arith.constant 0 : i32
    return %c0_i32, %c0_i32_0 : i32, i32
  }
  func.func @transform_2(%arg0: i32) -> (i32, i32) {
    %c0_i32 = arith.constant 0 : i32
    %c0_i32_0 = arith.constant 0 : i32
    %c0_i32_1 = arith.constant 0 : i32
    return %c0_i32, %c0_i32_0 : i32, i32
  }
  func.func @transform_3(%arg0: i32) -> (i32, i32) {
    %c0_i32 = arith.constant 0 : i32
    %c0_i32_0 = arith.constant 0 : i32
    return %arg0, %c0_i32 : i32, i32
  }
}

</mosaic_0001>

<bundles_post_ra>
// kernel: tpu_custom_call.1
= control target key start
LH: loop header
LB: loop body
LE: loop exit
PB: predicated region body
PF: predicated region fallthrough
CT: control target
= control target key end

     0   :  { %8 = vsyncpa [#allocation3], 0  ;;  %s2527_s0 = inlined_call_operand.vmem [shape: f32[512,32], index: 0, kind: input, shape index: {}]   ;;  %s2528_s1 = inlined_call_operand.vmem [shape: f32[32,64], index: 1, kind: input, shape index: {}]   ;;  %s2529_s2 = inlined_call_operand.vmem [shape: f32[1,64], index: 2, kind: input, shape index: {}]   ;;  %s2530_s3 = inlined_call_operand.hbm [shape: f32[512,128], index: 3, kind: output, shape index: {}]  }
   0x1   :  { %10 = vsyncpa [#allocation3 + $0x1], 0  ;;  %s1587_s12 = smov 0   ;;  %s1589_s13 = smov 0  }
   0x2   :  { %s1591_s14 = smov 0   ;;  %s1593_s15 = smov 0  }
   0x3 LB: > { %s1608_s16 = sadd.s32 4294967295, %s1560_s15   ;;  %s1305_s17 = sadd.s32 4294967294, %s1560_s15   ;;  %s1560_s15 = sphi %s1593_s15, %s2536_s15   ;;  %s1556_s14 = sphi %s1591_s14, %s2535_s14   ;;  %s1552_s13 = sphi %s1589_s13, %s2534_s13   ;;  %s1548_s12 = sphi %s1587_s12, %s2533_s12  }
   0x4   : > { %s1612_s18 = sadd.s32 1, %s1560_s15   ;;  %s91_s19 = sadd.s32 1, %s1556_s14 }
   0x5   : > { %s88_s20 = ssub.s32 %s1560_s15, %s1612_s18  ;;  %p101_p0 = scmp.ne.s32.totalorder %s1556_s14, %s1552_s13 }
   0x6   : > { %p89_p1 = scmp.eq.s32.totalorder %s88_s20, 0  ;;  %p102_p2 = scmp.eq.s32.totalorder %s1608_s16, 1 }
   0x7   : > { %p107_p3 = scmp.ne.s32.totalorder %s1552_s13, %s1548_s12  ;;  %p108_p4 = scmp.eq.s32.totalorder %s1305_s17, 1 }
   0x8   : > { %s1623_s21 = scalar_select %p89_p1, %s1556_s14, %s91_s19  }
   0x9   : > { %p1625_p5 = por %p102_p2, %p101_p0  ;;  %p1629_p6 = por %p108_p4, %p107_p3 }
   0xa   : > { %p1308_p7 = scmp.ge.s32.totalorder %s1560_s15, 1  ;;  %p141_p8 = scmp.lt.s32.totalorder %s1560_s15, 3 }
   0xc   : > { %p142_p9 = pnand %p1308_p7, %p141_p8 }
   0xd   : > { %v204_v0 = vld [vmem:[%s2528_s1] sm:$0xff] (!%p142_p9)  ;;  %v205_v1 = vld [vmem:[%s2528_s1 + $0x8] sm:$0xff] (!%p142_p9)  ;;  %v206_v2 = vld [vmem:[%s2528_s1 + $0x10] sm:$0xff] (!%p142_p9)  ;;  %s1310_s30 = sshll.u32 (!%p142_p9), %s1608_s16, 5  ;;  %vm215_vm0 = vcmask (!%p142_p9), 261120   ;;  %s162_s10 = sand.u32 (!%p142_p9), 1, %s1552_s13  }
   0xe   : > { %145 = sbr.rel (%p142_p9) target bundleno = 601 (0x259), region = 32  ;;  %v1443_v3 = vpack.c.bf16 (!%p142_p9), %v205_v1, %v204_v0  ;;  %v207_v4 = vld [vmem:[%s2528_s1 + $0x18] sm:$0xff] (!%p142_p9)  ;;  %p166_p10 = scmp.lt.s32.totalorder (!%p142_p9), %s1310_s30, 63  ;;  %v1721_v38 = vld [vmem:[%s2529_s2] ss:$0 sm:$0xff] (!%p142_p9)  ;;  %vm569_vm1 = vcmask (!%p142_p9), 523264  }
   0xf   : > { %v1447_v5 = vpack.c.bf16 (!%p142_p9), %v207_v4, %v206_v2  ;;  %s1309_s19 = sshll.u32 (!%p142_p9), %s162_s10, 8  ;;  %s1562_s24 = smov (!%p142_p9), 32   ;;  %vm954_vm2 = vcmask (!%p142_p9), 523520   ;;  %vm1115_vm3 = vcmask (!%p142_p9), 785920   ;;  %vm1196_vm4 = vcmask (!%p142_p9), 1048320  }
  0x10   : > { %1444 = vmatprep.subr.bf16.mxu0 (!%p142_p9), %v1443_v3  ;;  %1451 = vmatprep.subr.bf16.mxu1 (!%p142_p9), %v1443_v3  ;;  %s1730_s20 = scalar_lea.vmem (!%p142_p9), [#allocation2], %s1309_s19  ;;  %s1563_s25 = smov (!%p142_p9), 96  }
  0x11   : > { %1446 = vmatpush3.bf16.msra.mxu0 (!%p142_p9), %v1443_v3  ;;  %1453 = vmatpush3.bf16.msra.mxu1 (!%p142_p9), %v1443_v3  ;;  %s1350_s26 = sshll.u32 (!%p142_p9), %s1608_s16, 12  ;;  %s1243_s27 = sshll.u32 (!%p142_p9), %s1730_s20, 4  ;;  %s2474_s27 = int_to_ptr.vmem [resolvable:$true] %s1243_s27 }
  0x12   : > { %1448 = vmatprep.subr.bf16.mxu0 (!%p142_p9), %v1447_v5  ;;  %1452 = vmatprep.subr.bf16.mxu1 (!%p142_p9), %v1447_v5  ;;  %s2486_s16 = scalar_lea.sflag (!%p142_p9), [#allocation3], %s162_s10  ;;  %s1498_s4 = scalar_lea.vmem (!%p142_p9), %s2474_s27, 4096 }
  0x13   : > { %p1499_p11 = scmp.ne.s32.totalorder (!%p142_p9), %s2474_s27, %s1498_s4  ;;  %s1564_s5 = smov (!%p142_p9), [#allocation2]  }
  0x15   : > { %s2538_s30 = smov (!%p166_p10, %s1310_s30), 63  ;;  %1450 = vmatpush3.bf16.msra.mxu0 %v1447_v5  ;;  %1454 = vmatpush3.bf16.msra.mxu1 %v1447_v5  ;;  %p1500_p12 = pnand %p1499_p11, %p1625_p5 }
  0x16   : > { %s1311_s6 = sshll.u32 %s2538_s30, 3  ;;  %s2472_s30 = scalar_lea.hbm %s2530_s3, %s1350_s26 }
  0x17   : > { %s1651_s9 = scalar_lea.vmem %s2527_s0, %s1311_s6  ;;  %p1501_p13 = pneg %p1500_p12 }
  0x18   : > { %v172_v6 = vld [vmem:[%s1651_s9] sm:$0xff]  ;;  %v173_v8 = vld [vmem:[%s1651_s9 + $0x8] sm:$0xff]  ;;  %v174_v10 = vld [vmem:[%s1651_s9 + $0x10] sm:$0xff]  ;;  %s1502_s6 = sshll.u32 %s1564_s5, 4  ;;  %s1503_s6 = int_to_ptr.vmem [resolvable:$false] %s1502_s6 }
  0x19   : > { %v188_v7 = vld [vmem:[%s1651_s9 + $0x80] sm:$0xff]  ;;  %v189_v9 = vld [vmem:[%s1651_s9 + $0x88] sm:$0xff]  ;;  %1395 = vmatprep.mubr.msk.f32.mxu0 %vm215_vm0, %v172_v6  ;;  %v190_v11 = vld [vmem:[%s1651_s9 + $0x90] sm:$0xff]  ;;  %s1504_s7 = scalar_lea.vmem %s1503_s6, 8192  ;;  %p1505_p0 = scmp.lt.s32.totalorder %s2474_s27, %s1503_s6 }
  0x1a   : > { %1419 = vmatprep.mubr.msk.f32.mxu1 %vm215_vm0, %v188_v7  ;;  %1396 = vmatmul.mubr.msk.f32.vlgmr.msra.gmra.mrb[0].mxu0 %vm215_vm0, %v173_v8  ;;  %v175_v12 = vld [vmem:[%s1651_s9 + $0x18] sm:$0xff]  ;;  %v176_v14 = vld [vmem:[%s1651_s9 + $0x20] sm:$0xff]  ;;  %v177_v16 = vld [vmem:[%s1651_s9 + $0x28] sm:$0xff]  ;;  %p1506_p1 = scmp.lt.s32.totalorder %s1504_s7, %s1498_s4 }
  0x1b   : > { %1420 = vmatmul.mubr.msk.f32.vlgmr.msra.gmra.mrb[0].mxu1 %vm215_vm0, %v189_v9  ;;  %1398 = vmatprep.mubr.msk.f32.mxu0 %vm215_vm0, %v174_v10  ;;  %v191_v13 = vld [vmem:[%s1651_s9 + $0x98] sm:$0xff]  ;;  %v192_v15 = vld [vmem:[%s1651_s9 + $0xa0] sm:$0xff]  ;;  %v193_v17 = vld [vmem:[%s1651_s9 + $0xa8] sm:$0xff] }
  0x1c   : > { %1422 = vmatprep.mubr.msk.f32.mxu1 %vm215_vm0, %v190_v11  ;;  %v178_v18 = vld [vmem:[%s1651_s9 + $0x30] sm:$0xff]  ;;  %v179_v20 = vld [vmem:[%s1651_s9 + $0x38] sm:$0xff]  ;;  %v180_v22 = vld [vmem:[%s1651_s9 + $0x40] sm:$0xff]  ;;  %p1507_p2 = por %p1506_p1, %p1505_p0 }
  0x1d   : > { %v194_v19 = vld [vmem:[%s1651_s9 + $0xb0] sm:$0xff]  ;;  %v195_v21 = vld [vmem:[%s1651_s9 + $0xb8] sm:$0xff]  ;;  %v196_v23 = vld [vmem:[%s1651_s9 + $0xc0] sm:$0xff] }
  0x1e   : > { %1399 = vmatmul.mubr.msk.f32.gmra.mrb[2].mxu0 %vm215_vm0, %v175_v12  ;;  %v181_v24 = vld [vmem:[%s1651_s9 + $0x48] sm:$0xff]  ;;  %v182_v26 = vld [vmem:[%s1651_s9 + $0x50] sm:$0xff]  ;;  %v183_v28 = vld [vmem:[%s1651_s9 + $0x58] sm:$0xff]  ;;  %p1508_p3 = pnand %p1507_p2, %p1501_p13 }
  0x1f   : > { %1423 = vmatmul.mubr.msk.f32.gmra.mrb[2].mxu1 %vm215_vm0, %v191_v13  ;;  %1401 = vmatprep.mubr.msk.f32.mxu0 %vm215_vm0, %v176_v14  ;;  %v197_v25 = vld [vmem:[%s1651_s9 + $0xc8] sm:$0xff]  ;;  %v198_v27 = vld [vmem:[%s1651_s9 + $0xd0] sm:$0xff]  ;;  %v199_v29 = vld [vmem:[%s1651_s9 + $0xd8] sm:$0xff] }
  0x20   : > { %1425 = vmatprep.mubr.msk.f32.mxu1 %vm215_vm0, %v192_v15  ;;  %v184_v30 = vld [vmem:[%s1651_s9 + $0x60] sm:$0xff]  ;;  %v185_v32 = vld [vmem:[%s1651_s9 + $0x68] sm:$0xff]  ;;  %v186_v34 = vld [vmem:[%s1651_s9 + $0x70] sm:$0xff] }
  0x21   : > { %v200_v31 = vld [vmem:[%s1651_s9 + $0xe0] sm:$0xff]  ;;  %v201_v33 = vld [vmem:[%s1651_s9 + $0xe8] sm:$0xff]  ;;  %v202_v35 = vld [vmem:[%s1651_s9 + $0xf0] sm:$0xff] }
  0x22   : > { %1402 = vmatmul.mubr.msk.f32.gmra.mrb[4].mxu0 %vm215_vm0, %v177_v16  ;;  %v187_v36 = vld [vmem:[%s1651_s9 + $0x78] sm:$0xff] }
  0x23   : > { %1426 = vmatmul.mubr.msk.f32.gmra.mrb[4].mxu1 %vm215_vm0, %v193_v17  ;;  %1404 = vmatprep.mubr.msk.f32.mxu0 %vm215_vm0, %v178_v18  ;;  %v203_v37 = vld [vmem:[%s1651_s9 + $0xf8] sm:$0xff] }
  0x24   : > { %1428 = vmatprep.mubr.msk.f32.mxu1 %vm215_vm0, %v194_v19 }
  0x26   : > { %1405 = vmatmul.mubr.msk.f32.gmra.mrb[6].mxu0 %vm215_vm0, %v179_v20 }
  0x27   : > { %1429 = vmatmul.mubr.msk.f32.gmra.mrb[6].mxu1 %vm215_vm0, %v195_v21  ;;  %1407 = vmatprep.mubr.msk.f32.mxu0 %vm215_vm0, %v180_v22 }
  0x28   : > { %1431 = vmatprep.mubr.msk.f32.mxu1 %vm215_vm0, %v196_v23 }
  0x2a   : > { %1408 = vmatmul.mubr.msk.f32.gmra.mrb[8].mxu0 %vm215_vm0, %v181_v24 }
  0x2b   : > { %1432 = vmatmul.mubr.msk.f32.gmra.mrb[8].mxu1 %vm215_vm0, %v197_v25  ;;  %1410 = vmatprep.mubr.msk.f32.mxu0 %vm215_vm0, %v182_v26 }
  0x2c   : > { %1434 = vmatprep.mubr.msk.f32.mxu1 %vm215_vm0, %v198_v27 }
  0x2e   : > { %1411 = vmatmul.mubr.msk.f32.gmra.mrb[10].mxu0 %vm215_vm0, %v183_v28 }
  0x2f   : > { %1435 = vmatmul.mubr.msk.f32.gmra.mrb[10].mxu1 %vm215_vm0, %v199_v29  ;;  %1413 = vmatprep.mubr.msk.f32.mxu0 %vm215_vm0, %v184_v30 }
  0x30   : > { %1437 = vmatprep.mubr.msk.f32.mxu1 %vm215_vm0, %v200_v31 }
  0x32   : > { %1414 = vmatmul.mubr.msk.f32.gmra.mrb[12].mxu0 %vm215_vm0, %v185_v32 }
  0x33   : > { %1438 = vmatmul.mubr.msk.f32.gmra.mrb[12].mxu1 %vm215_vm0, %v201_v33  ;;  %1416 = vmatprep.mubr.msk.f32.mxu0 %vm215_vm0, %v186_v34 }
  0x34   : > { %1440 = vmatprep.mubr.msk.f32.mxu1 %vm215_vm0, %v202_v35 }
  0x36   : > { %1417 = vmatmul.mubr.msk.f32.gmra.mrb[14].mxu0 %vm215_vm0, %v187_v36 }
  0x37   : > { %1441 = vmatmul.mubr.msk.f32.gmra.mrb[14].mxu1 %vm215_vm0, %v203_v37 }
  0xed   : > { %v1397_v39 = vpop.f32.mrb[0].mxu0 }
  0xee   : > { %v1421_v40 = vpop.f32.mrb[0].mxu1  ;;  %v384_v41 = vadd.f32 %v1397_v39, %v1721_v38  ;;  %v378_v43 = vpop.f32.mrb[1].mxu0 }
  0xef   : > { %v464_v42 = vadd.f32 %v1421_v40, %v1721_v38  ;;  %v458_v44 = vpop.f32.mrb[1].mxu1  ;;  %v379_v45 = vadd.f32 %v1721_v38, %v378_v43 }
  0xf0   : > { %v459_v46 = vadd.f32 %v1721_v38, %v458_v44  ;;  %v538_v47 = vmax.f32 %v384_v41, 0.0 }
  0xf1   : > { %v554_v48 = vmax.f32 %v464_v42, 0.0  ;;  %v537_v49 = vmax.f32 %v379_v45, 0.0  ;;  %v1400_v51 = vpop.f32.mrb[2].mxu0 }
  0xf2   : > { %v553_v50 = vmax.f32 %v459_v46, 0.0  ;;  %v1424_v52 = vpop.f32.mrb[2].mxu1  ;;  %v571_v53 = vsel %vm569_vm1, %v538_v47, -inf  ;;  %875 = vst.msk [vmem:[%s1730_s20 + $0x8] sm:$0xff] %vm215_vm0, %v538_v47  ;;  %v394_v55 = vadd.f32 %v1400_v51, %v1721_v38  ;;  %1021 = vrot.lane.b32.xlu1 %v538_v47, %s1562_s24  ;;  %v388_v57 = vpop.f32.mrb[3].mxu0 }
  0xf3   : > { %v643_v54 = vsel %vm569_vm1, %v554_v48, -inf  ;;  %891 = vst.msk [vmem:[%s1730_s20 + $0x88] sm:$0xff] %vm215_vm0, %v554_v48  ;;  %v474_v56 = vadd.f32 %v1424_v52, %v1721_v38  ;;  %v468_v58 = vpop.f32.mrb[3].mxu1  ;;  %v570_v59 = vsel %vm569_vm1, %v537_v49, -inf  ;;  %874 = vst.msk [vmem:[%s1730_s20] sm:$0xff] %vm215_vm0, %v537_v49  ;;  %v389_v61 = vadd.f32 %v1721_v38, %v388_v57  ;;  %1019 = vrot.lane.b32.xlu0 %v537_v49, %s1562_s24 }
  0xf4   : > { %v642_v60 = vsel %vm569_vm1, %v553_v50, -inf  ;;  %890 = vst.msk [vmem:[%s1730_s20 + $0x80] sm:$0xff] %vm215_vm0, %v553_v50  ;;  %v469_v62 = vadd.f32 %v1721_v38, %v468_v58  ;;  %v1749_v63 = vmax.f32 %v570_v59, %v571_v53  ;;  %v540_v1 = vmax.f32 %v394_v55, 0.0 }
  0xf5   : > { %v1751_v0 = vmax.f32 %v642_v60, %v643_v54  ;;  %v556_v2 = vmax.f32 %v474_v56, 0.0  ;;  %v539_v3 = vmax.f32 %v389_v61, 0.0  ;;  %v1403_v5 = vpop.f32.mrb[4].mxu0 }
  0xf6   : > { %v555_v4 = vmax.f32 %v469_v62, 0.0  ;;  %v1427_v6 = vpop.f32.mrb[4].mxu1  ;;  %v580_v7 = vsel %vm569_vm1, %v540_v1, -inf  ;;  %877 = vst.msk [vmem:[%s1730_s20 + $0x18] sm:$0xff] %vm215_vm0, %v540_v1  ;;  %1053 = vrot.lane.b32.xlu1 %v554_v48, %s1562_s24  ;;  %v398_v9 = vpop.f32.mrb[5].mxu0  ;;  %v404_v13 = vadd.f32 %v1403_v5, %v1721_v38  ;;  %v573_v23 = vrot.slane %v1749_v63, 4 }
  0xf7   : > { %v652_v8 = vsel %vm569_vm1, %v556_v2, -inf  ;;  %893 = vst.msk [vmem:[%s1730_s20 + $0x98] sm:$0xff] %vm215_vm0, %v556_v2  ;;  %v478_v10 = vpop.f32.mrb[5].mxu1  ;;  %v579_v11 = vsel %vm569_vm1, %v539_v3, -inf  ;;  %876 = vst.msk [vmem:[%s1730_s20 + $0x10] sm:$0xff] %vm215_vm0, %v539_v3  ;;  %v399_v14 = vadd.f32 %v1721_v38, %v398_v9  ;;  %1051 = vrot.lane.b32.xlu0 %v553_v50, %s1562_s24  ;;  %v484_v17 = vadd.f32 %v1427_v6, %v1721_v38 }
  0xf8   : > { %v651_v12 = vsel %vm569_vm1, %v555_v4, -inf  ;;  %892 = vst.msk [vmem:[%s1730_s20 + $0x90] sm:$0xff] %vm215_vm0, %v555_v4  ;;  %v1769_v15 = vmax.f32 %v579_v11, %v580_v7  ;;  %v479_v18 = vadd.f32 %v1721_v38, %v478_v10  ;;  %v542_v19 = vmax.f32 %v404_v13, 0.0 }
  0xf9   : > { %v1771_v16 = vmax.f32 %v651_v12, %v652_v8  ;;  %v541_v20 = vmax.f32 %v399_v14, 0.0  ;;  %v1406_v21 = vpop.f32.mrb[6].mxu0  ;;  %v1776_v24 = vmax.f32 %v484_v17, 0.0  ;;  %v645_v43 = vrot.slane %v1751_v0, 4 }
  0xfa   : > { %v1430_v22 = vpop.f32.mrb[6].mxu1  ;;  %1025 = vrot.lane.b32.xlu1 %v540_v1, %s1562_s24  ;;  %v1779_v25 = vmax.f32 %v479_v18, 0.0  ;;  %v408_v26 = vpop.f32.mrb[7].mxu0  ;;  %v589_v28 = vsel %vm569_vm1, %v542_v19, -inf  ;;  %879 = vst.msk [vmem:[%s1730_s20 + $0x28] sm:$0xff] %vm215_vm0, %v542_v19  ;;  %v414_v30 = vadd.f32 %v1406_v21, %v1721_v38  ;;  %v574_v52 = vmax.f32 %v1749_v63, %v573_v23 }
  0xfb   : > { %v488_v27 = vpop.f32.mrb[7].mxu1  ;;  %v588_v29 = vsel %vm569_vm1, %v541_v20, -inf  ;;  %878 = vst.msk [vmem:[%s1730_s20 + $0x20] sm:$0xff] %vm215_vm0, %v541_v20  ;;  %1023 = vrot.lane.b32.xlu0 %v539_v3, %s1562_s24  ;;  %v409_v31 = vadd.f32 %v1721_v38, %v408_v26  ;;  %v661_v33 = vsel %vm569_vm1, %v1776_v24, -inf  ;;  %895 = vst.msk [vmem:[%s1730_s20 + $0xa8] sm:$0xff] %vm215_vm0, %v1776_v24  ;;  %v494_v35 = vadd.f32 %v1430_v22, %v1721_v38 }
  0xfc   : > { %v1790_v32 = vmax.f32 %v588_v29, %v589_v28  ;;  %v660_v34 = vsel %vm569_vm1, %v1779_v25, -inf  ;;  %894 = vst.msk [vmem:[%s1730_s20 + $0xa0] sm:$0xff] %vm215_vm0, %v1779_v25  ;;  %v1805_v37 = vmax.f32 %v414_v30, 0.0  ;;  %v489_v40 = vadd.f32 %v1721_v38, %v488_v27 }
  0xfd   : > { %v1803_v36 = vmax.f32 %v660_v34, %v661_v33  ;;  %v1807_v39 = vmax.f32 %v409_v31, 0.0  ;;  %v1409_v41 = vpop.f32.mrb[8].mxu0  ;;  %v1812_v44 = vmax.f32 %v494_v35, 0.0  ;;  %v646_v7 = vmax.f32 %v1751_v0, %v645_v43 }
  0xfe   : > { %v1433_v42 = vpop.f32.mrb[8].mxu1  ;;  %1057 = vrot.lane.b32.xlu1 %v556_v2, %s1562_s24  ;;  %v424_v45 = vadd.f32 %v1409_v41, %v1721_v38  ;;  %v418_v46 = vpop.f32.mrb[9].mxu0  ;;  %v598_v49 = vsel %vm569_vm1, %v1805_v37, -inf  ;;  %881 = vst.msk [vmem:[%s1730_s20 + $0x38] sm:$0xff] %vm215_vm0, %v1805_v37  ;;  %v1827_v51 = vmax.f32 %v489_v40, 0.0  ;;  %v575_v9 = vrot.slane %v574_v52, 2 }
  0xff   : > { %v504_v47 = vadd.f32 %v1433_v42, %v1721_v38  ;;  %v498_v48 = vpop.f32.mrb[9].mxu1  ;;  %v597_v50 = vsel %vm569_vm1, %v1807_v39, -inf  ;;  %880 = vst.msk [vmem:[%s1730_s20 + $0x30] sm:$0xff] %vm215_vm0, %v1807_v39  ;;  %1055 = vrot.lane.b32.xlu0 %v555_v4, %s1562_s24  ;;  %v670_v54 = vsel %vm569_vm1, %v1812_v44, -inf  ;;  %897 = vst.msk [vmem:[%s1730_s20 + $0xb8] sm:$0xff] %vm215_vm0, %v1812_v44  ;;  %v419_v56 = vadd.f32 %v1721_v38, %v418_v46 }
 0x100   : > { %v1830_v53 = vmax.f32 %v597_v50, %v598_v49  ;;  %v1837_v55 = vmax.f32 %v424_v45, 0.0  ;;  %v669_v57 = vsel %vm569_vm1, %v1827_v51, -inf  ;;  %896 = vst.msk [vmem:[%s1730_s20 + $0xb0] sm:$0xff] %vm215_vm0, %v1827_v51  ;;  %v499_v59 = vadd.f32 %v1721_v38, %v498_v48 }
 0x101   : > { %v1845_v58 = vmax.f32 %v504_v47, 0.0  ;;  %v1412_v60 = vpop.f32.mrb[10].mxu0  ;;  %v1849_v62 = vmax.f32 %v669_v57, %v670_v54  ;;  %v1856_v1 = vmax.f32 %v419_v56, 0.0  ;;  %v654_v12 = vrot.slane %v1771_v16, 4 }
 0x102   : > { %v1436_v61 = vpop.f32.mrb[10].mxu1  ;;  %1029 = vrot.lane.b32.xlu1 %v542_v19, %s1562_s24  ;;  %v607_v63 = vsel %vm569_vm1, %v1837_v55, -inf  ;;  %883 = vst.msk [vmem:[%s1730_s20 + $0x48] sm:$0xff] %vm215_vm0, %v1837_v55  ;;  %v428_v2 = vpop.f32.mrb[11].mxu0  ;;  %v1864_v5 = vmax.f32 %v499_v59, 0.0  ;;  %v434_v6 = vadd.f32 %v1412_v60, %v1721_v38  ;;  %v582_v46 = vrot.slane %v1769_v15, 4 }
 0x103   : > { %v508_v3 = vpop.f32.mrb[11].mxu1  ;;  %1027 = vrot.lane.b32.xlu0 %v541_v20, %s1562_s24  ;;  %v679_v4 = vsel %vm569_vm1, %v1845_v58, -inf  ;;  %899 = vst.msk [vmem:[%s1730_s20 + $0xc8] sm:$0xff] %vm215_vm0, %v1845_v58  ;;  %v606_v8 = vsel %vm569_vm1, %v1856_v1, -inf  ;;  %882 = vst.msk [vmem:[%s1730_s20 + $0x40] sm:$0xff] %vm215_vm0, %v1856_v1  ;;  %v429_v10 = vadd.f32 %v1721_v38, %v428_v2  ;;  %v514_v11 = vadd.f32 %v1436_v61, %v1721_v38 }
 0x104   : > { %v1876_v13 = vmax.f32 %v606_v8, %v607_v63  ;;  %v678_v14 = vsel %vm569_vm1, %v1864_v5, -inf  ;;  %898 = vst.msk [vmem:[%s1730_s20 + $0xc0] sm:$0xff] %vm215_vm0, %v1864_v5  ;;  %v1883_v0 = vmax.f32 %v434_v6, 0.0  ;;  %v509_v27 = vadd.f32 %v1721_v38, %v508_v3 }
 0x105   : > { %v1415_v17 = vpop.f32.mrb[12].mxu0  ;;  %v1887_v19 = vmax.f32 %v678_v14, %v679_v4  ;;  %v1889_v20 = vmax.f32 %v429_v10, 0.0  ;;  %v1891_v21 = vmax.f32 %v514_v11, 0.0  ;;  %v655_v33 = vmax.f32 %v1771_v16, %v654_v12 }
 0x106   : > { %v1439_v18 = vpop.f32.mrb[12].mxu1  ;;  %1061 = vrot.lane.b32.xlu1 %v1776_v24, %s1562_s24  ;;  %v438_v22 = vpop.f32.mrb[13].mxu0  ;;  %v616_v26 = vsel %vm569_vm1, %v1883_v0, -inf  ;;  %885 = vst.msk [vmem:[%s1730_s20 + $0x58] sm:$0xff] %vm215_vm0, %v1883_v0  ;;  %v576_v24 = vmax.f32 %v574_v52, %v575_v9  ;;  %v1913_v31 = vmax.f32 %v509_v27, 0.0  ;;  %v444_v34 = vadd.f32 %v1415_v17, %v1721_v38 }
 0x107   : > { %v518_v23 = vpop.f32.mrb[13].mxu1  ;;  %1059 = vrot.lane.b32.xlu0 %v1779_v25, %s1562_s24  ;;  %v615_v28 = vsel %vm569_vm1, %v1889_v20, -inf  ;;  %884 = vst.msk [vmem:[%s1730_s20 + $0x50] sm:$0xff] %vm215_vm0, %v1889_v20  ;;  %v688_v29 = vsel %vm569_vm1, %v1891_v21, -inf  ;;  %901 = vst.msk [vmem:[%s1730_s20 + $0xd8] sm:$0xff] %vm215_vm0, %v1891_v21  ;;  %v647_v25 = vrot.slane %v646_v7, 2  ;;  %v439_v41 = vadd.f32 %v1721_v38, %v438_v22 }
 0x108   : > { %v1911_v30 = vmax.f32 %v615_v28, %v616_v26  ;;  %v524_v42 = vadd.f32 %v1439_v18, %v1721_v38  ;;  %v687_v16 = vsel %vm569_vm1, %v1913_v31, -inf  ;;  %900 = vst.msk [vmem:[%s1730_s20 + $0xd0] sm:$0xff] %vm215_vm0, %v1913_v31  ;;  %v656_v48 = vrot.slane %v655_v33, 2 }
 0x109   : > { %v1418_v35 = vpop.f32.mrb[14].mxu0  ;;  %v1931_v47 = vmax.f32 %v687_v16, %v688_v29  ;;  %v1933_v49 = vmax.f32 %v439_v41, 0.0  ;;  %v577_v52 = vrot.slane %v576_v24, 1  ;;  %v648_v54 = vmax.f32 %v646_v7, %v647_v25 }
 0x10a   : > { %v1442_v40 = vpop.f32.mrb[14].mxu1  ;;  %1033 = vrot.lane.b32.xlu1 %v1805_v37, %s1562_s24  ;;  %v448_v43 = vpop.f32.mrb[15].mxu0  ;;  %v1929_v37 = vmax.f32 %v444_v34, 0.0  ;;  %v1935_v50 = vmax.f32 %v524_v42, 0.0  ;;  %v519_v56 = vadd.f32 %v1721_v38, %v518_v23  ;;  %v657_v63 = vmax.f32 %v655_v33, %v656_v48 }
 0x10b   : > { %v528_v45 = vpop.f32.mrb[15].mxu1  ;;  %1031 = vrot.lane.b32.xlu0 %v1807_v39, %s1562_s24  ;;  %v624_v57 = vsel %vm569_vm1, %v1933_v49, -inf  ;;  %886 = vst.msk [vmem:[%s1730_s20 + $0x60] sm:$0xff] %vm215_vm0, %v1933_v49  ;;  %v454_v2 = vadd.f32 %v1418_v35, %v1721_v38  ;;  %v449_v3 = vadd.f32 %v1721_v38, %v448_v43  ;;  %v1964_v4 = vmax.f32 %v576_v24, %v577_v52 }
 0x10c   : > { %v625_v39 = vsel %vm569_vm1, %v1929_v37, -inf  ;;  %887 = vst.msk [vmem:[%s1730_s20 + $0x68] sm:$0xff] %vm215_vm0, %v1929_v37  ;;  %903 = vst.msk [vmem:[%s1730_s20 + $0xe8] sm:$0xff] %vm215_vm0, %v1935_v50  ;;  %v697_v60 = vsel %vm569_vm1, %v1935_v50, -inf  ;;  %v1959_v61 = vmax.f32 %v519_v56, 0.0  ;;  %v649_v6 = vrot.slane %v648_v54, 1 }
 0x10d   : > { %v1955_v59 = vmax.f32 %v624_v57, %v625_v39  ;;  %v1976_v9 = vmax.f32 %v454_v2, 0.0  ;;  %v1978_v10 = vmax.f32 %v449_v3, 0.0  ;;  %v658_v11 = vrot.slane %v657_v63, 1 }
 0x10e   : > { %1065 = vrot.lane.b32.xlu1 %v1812_v44, %s1562_s24  ;;  %v591_v44 = vrot.slane %v1790_v32, 4  ;;  %v696_v7 = vsel %vm569_vm1, %v1959_v61, -inf  ;;  %902 = vst.msk [vmem:[%s1730_s20 + $0xe0] sm:$0xff] %vm215_vm0, %v1959_v61  ;;  %v1994_v17 = vmax.f32 %v648_v54, %v649_v6  ;;  %v663_v29 = vrot.slane %v1803_v36, 4 }
 0x10f   : > { %1063 = vrot.lane.b32.xlu0 %v1827_v51, %s1562_s24  ;;  %v583_v51 = vmax.f32 %v1769_v15, %v582_v46  ;;  %v1974_v8 = vmax.f32 %v696_v7, %v697_v60  ;;  %v534_v15 = vadd.f32 %v1442_v40, %v1721_v38  ;;  %v634_v14 = vsel %vm569_vm1, %v1976_v9, -inf  ;;  %889 = vst.msk [vmem:[%s1730_s20 + $0x78] sm:$0xff] %vm215_vm0, %v1976_v9 }
 0x110   : > { %v592_v12 = vmax.f32 %v1790_v32, %v591_v44  ;;  %888 = vst.msk [vmem:[%s1730_s20 + $0x70] sm:$0xff] %vm215_vm0, %v1978_v10  ;;  %v529_v32 = vadd.f32 %v1721_v38, %v528_v45  ;;  %v2008_v26 = vmax.f32 %v657_v63, %v658_v11  ;;  %v600_v33 = vrot.slane %v1830_v53, 4 }
 0x111   : > { %v584_v18 = vrot.slane %v583_v51, 2  ;;  %v1998_v23 = vmax.f32 %v534_v15, 0.0  ;;  %v664_v40 = vmax.f32 %v1803_v36, %v663_v29  ;;  %v672_v41 = vrot.slane %v1849_v62, 4 }
 0x112   : > { %1037 = vrot.lane.b32.xlu1 %v1837_v55, %s1562_s24  ;;  %v633_v55 = vsel %vm569_vm1, %v1978_v10, -inf  ;;  %v593_v27 = vrot.slane %v592_v12, 2  ;;  %v2012_v28 = vmax.f32 %v529_v32, 0.0  ;;  %v601_v43 = vmax.f32 %v1830_v53, %v600_v33 }
 0x113   : > { %730 = vrot.lane.b32.xlu0 %v1964_v4, %s1563_s25  ;;  %v1996_v22 = vmax.f32 %v633_v55, %v634_v14  ;;  %905 = vst.msk [vmem:[%s1730_s20 + $0xf8] sm:$0xff] %vm215_vm0, %v1998_v23  ;;  %v706_v24 = vsel %vm569_vm1, %v1998_v23, -inf  ;;  %v585_v25 = vmax.f32 %v583_v51, %v584_v18  ;;  %v673_v46 = vmax.f32 %v1849_v62, %v672_v41 }
 0x114   : > { %v705_v38 = vsel %vm569_vm1, %v2012_v28, -inf  ;;  %904 = vst.msk [vmem:[%s1730_s20 + $0xf0] sm:$0xff] %vm215_vm0, %v2012_v28  ;;  %v594_v34 = vmax.f32 %v592_v12, %v593_v27  ;;  %v609_v54 = vrot.slane %v1876_v13, 4  ;;  %v681_v57 = vrot.slane %v1887_v19, 4 }
 0x115   : > { %v586_v35 = vrot.slane %v585_v25, 1  ;;  %v674_v16 = vrot.slane %v673_v46, 2  ;;  %v627_v3 = vrot.slane %v1955_v59, 4  ;;  %v699_v15 = vrot.slane %v1974_v8, 4 }
 0x116   : > { %1069 = vrot.lane.b32.xlu1 %v1845_v58, %s1562_s24  ;;  %v707_v58 = vmax.f32 %v705_v38, %v706_v24  ;;  %v595_v42 = vrot.slane %v594_v34, 1  ;;  %v610_v60 = vmax.f32 %v1876_v13, %v609_v54  ;;  %v682_v6 = vmax.f32 %v1887_v19, %v681_v57 }
 0x117   : > { %746 = vrot.lane.b32.xlu0 %v1994_v17, %s1563_s25  ;;  %v2032_v45 = vmax.f32 %v585_v25, %v586_v35  ;;  %v675_v62 = vmax.f32 %v673_v46, %v674_v16  ;;  %v628_v12 = vmax.f32 %v1955_v59, %v627_v3 }
 0x118   : > { %v2038_v36 = vmax.f32 %v594_v34, %v595_v42  ;;  %v708_v13 = vrot.slane %v707_v58, 4 }
 0x119   : > { %v676_v56 = vrot.slane %v675_v62, 1  ;;  %v629_v27 = vrot.slane %v628_v12, 2 }
 0x11a   : > { %748 = vrot.lane.b32.xlu1 %v2008_v26, %s1563_s25  ;;  %v709_v55 = vmax.f32 %v707_v58, %v708_v13 }
 0x11b   : > { %1035 = vrot.lane.b32.xlu0 %v1856_v1, %s1562_s24  ;;  %v665_v1 = vrot.slane %v664_v40, 2  ;;  %v2068_v44 = vmax.f32 %v675_v62, %v676_v56  ;;  %v630_v38 = vmax.f32 %v628_v12, %v629_v27 }
 0x11d   : > { %v631_v34 = vrot.slane %v630_v38, 1 }
 0x11e   : > { %1041 = vrot.lane.b32.xlu1 %v1883_v0, %s1562_s24  ;;  %v602_v0 = vrot.slane %v601_v43, 2 }
 0x11f   : > { %1067 = vrot.lane.b32.xlu0 %v1864_v5, %s1562_s24  ;;  %v666_v5 = vmax.f32 %v664_v40, %v665_v1  ;;  %v2107_v42 = vmax.f32 %v630_v38, %v631_v34 }
 0x120   : > { %v603_v53 = vmax.f32 %v601_v43, %v602_v0 }
 0x121   : > { %v667_v48 = vrot.slane %v666_v5, 1 }
 0x122   : > { %1073 = vrot.lane.b32.xlu1 %v1891_v21, %s1562_s24  ;;  %v618_v21 = vrot.slane %v1911_v30, 4  ;;  %v604_v52 = vrot.slane %v603_v53, 1 }
 0x123   : > { %732 = vrot.lane.b32.xlu0 %v2032_v45, %s1563_s25  ;;  %v2051_v39 = vmax.f32 %v666_v5, %v667_v48 }
 0x126   : > { %734 = vrot.lane.b32.xlu1 %v2038_v36, %s1563_s25 }
 0x127   : > { %1039 = vrot.lane.b32.xlu0 %v1889_v20, %s1562_s24  ;;  %v690_v20 = vrot.slane %v1931_v47, 4 }
 0x129   : > { %v691_v2 = vmax.f32 %v1931_v47, %v690_v20  ;;  %v683_v47 = vrot.slane %v682_v6, 2 }
 0x12a   : > { %1045 = vrot.lane.b32.xlu1 %v1929_v37, %s1562_s24  ;;  %v2058_v37 = vmax.f32 %v603_v53, %v604_v52 }
 0x12b   : > { %1071 = vrot.lane.b32.xlu0 %v1913_v31, %s1562_s24  ;;  %v619_v31 = vmax.f32 %v1911_v30, %v618_v21  ;;  %v611_v30 = vrot.slane %v610_v60, 2  ;;  %v692_v51 = vrot.slane %v691_v2, 2  ;;  %v684_v32 = vmax.f32 %v682_v6, %v683_v47 }
 0x12d   : > { %v620_v63 = vrot.slane %v619_v31, 2  ;;  %v612_v11 = vmax.f32 %v610_v60, %v611_v30  ;;  %v693_v14 = vmax.f32 %v691_v2, %v692_v51  ;;  %v685_v25 = vrot.slane %v684_v32, 1 }
 0x12e   : > { %1077 = vrot.lane.b32.xlu1 %v1935_v50, %s1562_s24  ;;  %v636_v50 = vrot.slane %v1996_v22, 4  ;;  %v794_v60 = vlaneseq }
 0x12f   : > { %750 = vrot.lane.b32.xlu0 %v2051_v39, %s1563_s25  ;;  %v613_v18 = vrot.slane %v612_v11, 1  ;;  %v2099_v33 = vmax.f32 %v684_v32, %v685_v25 }
 0x130   : > { %v637_v7 = vmax.f32 %v1996_v22, %v636_v50  ;;  %v700_v22 = vmax.f32 %v1974_v8, %v699_v15  ;;  %v795_v2 = vshrl.u32 %v794_v60, 7 }
 0x131   : > { %v2091_v29 = vmax.f32 %v612_v11, %v613_v18 }
 0x132   : > { %736 = vrot.lane.b32.xlu1 %v2058_v37, %s1563_s25  ;;  %v701_v58 = vrot.slane %v700_v22, 2  ;;  %v2155_v6 = vsub.s32 0, %v795_v2 }
 0x133   : > { %1043 = vrot.lane.b32.xlu0 %v1933_v49, %s1562_s24  ;;  %v621_v49 = vmax.f32 %v619_v31, %v620_v63 }
 0x134   : > { %v702_v35 = vmax.f32 %v700_v22, %v701_v58 }
 0x135   : > { %v622_v19 = vrot.slane %v621_v49, 1 }
 0x136   : > { %752 = vrot.lane.b32.xlu1 %v2068_v44, %s1563_s25  ;;  %v703_v43 = vrot.slane %v702_v35, 1 }
 0x137   : > { %1075 = vrot.lane.b32.xlu0 %v1959_v61, %s1562_s24  ;;  %v638_v61 = vrot.slane %v637_v7, 2  ;;  %v2089_v59 = vmax.f32 %v621_v49, %v622_v19 }
 0x138   : > { %v2115_v0 = vmax.f32 %v702_v35, %v703_v43 }
 0x139   : > { %v639_v24 = vmax.f32 %v637_v7, %v638_v61 }
 0x13a   : > { %1049 = vrot.lane.b32.xlu1 %v1976_v9, %s1562_s24  ;;  %v694_v9 = vrot.slane %v693_v14, 1 }
 0x13b   : > { %1047 = vrot.lane.b32.xlu0 %v1978_v10, %s1562_s24  ;;  %v710_v10 = vrot.slane %v709_v55, 2 }
 0x13c   : > { %v2097_v8 = vmax.f32 %v693_v14, %v694_v9 }
 0x13e   : > { %1081 = vrot.lane.b32.xlu1 %v1998_v23, %s1562_s24  ;;  %v640_v23 = vrot.slane %v639_v24, 1 }
 0x13f   : > { %1079 = vrot.lane.b32.xlu0 %v2012_v28, %s1562_s24  ;;  %v711_v28 = vmax.f32 %v709_v55, %v710_v10 }
 0x140   : > { %v2105_v40 = vmax.f32 %v639_v24, %v640_v23 }
 0x141   : > { %v712_v41 = vrot.slane %v711_v28, 1 }
 0x142   : > { %740 = vrot.lane.b32.xlu1 %v2089_v59, %s1563_s25 }
 0x143   : > { %738 = vrot.lane.b32.xlu0 %v2091_v29, %s1563_s25  ;;  %v2113_v1 = vmax.f32 %v711_v28, %v712_v41 }
 0x146   : > { %756 = vrot.lane.b32.xlu1 %v2097_v8, %s1563_s25 }
 0x147   : > { %754 = vrot.lane.b32.xlu0 %v2099_v33, %s1563_s25 }
 0x14a   : > { %744 = vrot.lane.b32.xlu1 %v2105_v40, %s1563_s25 }
 0x14b   : > { %742 = vrot.lane.b32.xlu0 %v2107_v42, %s1563_s25 }
 0x14e   : > { %760 = vrot.lane.b32.xlu1 %v2113_v1, %s1563_s25 }
 0x14f   : > { %758 = vrot.lane.b32.xlu0 %v2115_v0, %s1563_s25 }
 0x164   : > { %v2121_v46 = vpop.permute.xlu1 %1021 }
 0x165   : > { %v2123_v5 = vpop.permute.xlu0 %1019 }
 0x168   : > { %v2125_v53 = vpop.permute.xlu1 %1053 }
 0x169   : > { %v2127_v16 = vpop.permute.xlu0 %1051 }
 0x16c   : > { %v2129_v48 = vpop.permute.xlu1 %1025 }
 0x16d   : > { %v2131_v21 = vpop.permute.xlu0 %1023 }
 0x170   : > { %v2133_v52 = vpop.permute.xlu1 %1057 }
 0x171   : > { %v2135_v62 = vpop.permute.xlu0 %1055 }
 0x174   : > { %v2137_v54 = vpop.permute.xlu1 %1029 }
 0x175   : > { %v2139_v20 = vpop.permute.xlu0 %1027 }
 0x178   : > { %v2141_v56 = vpop.permute.xlu1 %1061 }
 0x179   : > { %v2143_v31 = vpop.permute.xlu0 %1059 }
 0x17c   : > { %v2145_v57 = vpop.permute.xlu1 %1033 }
 0x17d   : > { %v2147_v50 = vpop.permute.xlu0 %1031 }
 0x180   : > { %v2149_v63 = vpop.permute.xlu1 %1065 }
 0x181   : > { %v2151_v3 = vpop.permute.xlu0 %1063 }
 0x184   : > { %v2153_v30 = vpop.permute.xlu1 %1037 }
 0x185   : > { %v731_v13 = vpop.permute.xlu0 %730 }
 0x186   : > { %v778_v49 = vmax.f32 %v1964_v4, %v731_v13 }
 0x188   : > { %v797_v51 = vrot.slane %v778_v49, %v2155_v6  ;;  %v2159_v7 = vpop.permute.xlu1 %1069 }
 0x189   : > { %v747_v15 = vpop.permute.xlu0 %746 }
 0x18a   : > { %v786_v11 = vmax.f32 %v1994_v17, %v747_v15  ;;  %906 = vrot.lane.b32.xlu0 %v797_v51, %s1562_s24 }
 0x18c   : > { %v829_v47 = vrot.slane %v786_v11, %v2155_v6  ;;  %v749_v12 = vpop.permute.xlu1 %748 }
 0x18d   : > { %v2164_v19 = vpop.permute.xlu0 %1035  ;;  %v787_v18 = vmax.f32 %v2008_v26, %v749_v12 }
 0x18e   : > { %922 = vrot.lane.b32.xlu0 %v829_v47, %s1562_s24 }
 0x18f   : > { %v833_v10 = vrot.slane %v787_v18, %v2155_v6 }
 0x190   : > { %v2167_v14 = vpop.permute.xlu1 %1041 }
 0x191   : > { %v2169_v61 = vpop.permute.xlu0 %1067 }
 0x192   : > { %1148 = vrot.lane.b32.xlu0 %v797_v51, %s1563_s25 }
 0x194   : > { %v2172_v4 = vpop.permute.xlu1 %1073 }
 0x195   : > { %v733_v55 = vpop.permute.xlu0 %732 }
 0x196   : > { %v779_v17 = vmax.f32 %v2032_v45, %v733_v55  ;;  %1164 = vrot.lane.b32.xlu0 %v829_v47, %s1563_s25 }
 0x198   : > { %v801_v32 = vrot.slane %v779_v17, %v2155_v6  ;;  %v735_v27 = vpop.permute.xlu1 %734 }
 0x199   : > { %v780_v22 = vmax.f32 %v2038_v36, %v735_v27  ;;  %v2179_v9 = vpop.permute.xlu0 %1039 }
 0x19a   : > { %908 = vrot.lane.b32.xlu1 %v801_v32, %s1562_s24 }
 0x19b   : > { %v805_v24 = vrot.slane %v780_v22, %v2155_v6 }
 0x19c   : > { %v2184_v25 = vpop.permute.xlu1 %1045 }
 0x19d   : > { %910 = vrot.lane.b32.xlu0 %v805_v24, %s1562_s24  ;;  %v2187_v45 = vpop.permute.xlu0 %1071 }
 0x19e   : > { %924 = vrot.lane.b32.xlu1 %v833_v10, %s1562_s24 }
 0x1a0   : > { %v2190_v26 = vpop.permute.xlu1 %1077 }
 0x1a1   : > { %v751_v38 = vpop.permute.xlu0 %750 }
 0x1a2   : > { %v788_v36 = vmax.f32 %v2051_v39, %v751_v38  ;;  %1150 = vrot.lane.b32.xlu1 %v801_v32, %s1563_s25 }
 0x1a4   : > { %v837_v58 = vrot.slane %v788_v36, %v2155_v6  ;;  %v737_v23 = vpop.permute.xlu1 %736 }
 0x1a5   : > { %v781_v28 = vmax.f32 %v2058_v37, %v737_v23  ;;  %v2196_v34 = vpop.permute.xlu0 %1043 }
 0x1a6   : > { %1166 = vrot.lane.b32.xlu1 %v833_v10, %s1563_s25  ;;  %926 = vrot.lane.b32.xlu0 %v837_v58, %s1562_s24 }
 0x1a7   : > { %v809_v35 = vrot.slane %v781_v28, %v2155_v6 }
 0x1a8   : > { %v753_v41 = vpop.permute.xlu1 %752 }
 0x1a9   : > { %v789_v43 = vmax.f32 %v2068_v44, %v753_v41  ;;  %v2202_v60 = vpop.permute.xlu0 %1075 }
 0x1aa   : > { %912 = vrot.lane.b32.xlu1 %v809_v35, %s1562_s24  ;;  %1152 = vrot.lane.b32.xlu0 %v805_v24, %s1563_s25 }
 0x1ab   : > { %v841_v39 = vrot.slane %v789_v43, %v2155_v6 }
 0x1ac   : > { %v2207_v37 = vpop.permute.xlu1 %1049 }
 0x1ad   : > { %v2209_v2 = vpop.permute.xlu0 %1047 }
 0x1ae   : > { %928 = vrot.lane.b32.xlu1 %v841_v39, %s1562_s24  ;;  %1168 = vrot.lane.b32.xlu0 %v837_v58, %s1563_s25 }
 0x1b0   : > { %v2213_v13 = vpop.permute.xlu1 %1081 }
 0x1b1   : > { %v2215_v49 = vpop.permute.xlu0 %1079 }
 0x1b2   : > { %1154 = vrot.lane.b32.xlu1 %v809_v35, %s1563_s25 }
 0x1b4   : > { %v741_v44 = vpop.permute.xlu1 %740 }
 0x1b5   : > { %v783_v51 = vmax.f32 %v2089_v59, %v741_v44  ;;  %v739_v15 = vpop.permute.xlu0 %738 }
 0x1b6   : > { %v782_v11 = vmax.f32 %v2091_v29, %v739_v15  ;;  %1170 = vrot.lane.b32.xlu1 %v841_v39, %s1563_s25 }
 0x1b7   : > { %v817_v47 = vrot.slane %v783_v51, %v2155_v6 }
 0x1b8   : > { %v813_v12 = vrot.slane %v782_v11, %v2155_v6  ;;  %v757_v55 = vpop.permute.xlu1 %756 }
 0x1b9   : > { %v791_v17 = vmax.f32 %v2097_v8, %v757_v55  ;;  %v755_v18 = vpop.permute.xlu0 %754 }
 0x1ba   : > { %v790_v32 = vmax.f32 %v2099_v33, %v755_v18  ;;  %916 = vrot.lane.b32.xlu1 %v817_v47, %s1562_s24  ;;  %914 = vrot.lane.b32.xlu0 %v813_v12, %s1562_s24 }
 0x1bb   : > { %v849_v59 = vrot.slane %v791_v17, %v2155_v6 }
 0x1bc   : > { %v845_v29 = vrot.slane %v790_v32, %v2155_v6  ;;  %v745_v27 = vpop.permute.xlu1 %744 }
 0x1bd   : > { %v743_v22 = vpop.permute.xlu0 %742  ;;  %v785_v8 = vmax.f32 %v2105_v40, %v745_v27 }
 0x1be   : > { %932 = vrot.lane.b32.xlu1 %v849_v59, %s1562_s24  ;;  %930 = vrot.lane.b32.xlu0 %v845_v29, %s1562_s24  ;;  %v784_v33 = vmax.f32 %v2107_v42, %v743_v22 }
 0x1bf   : > { %v825_v38 = vrot.slane %v785_v8, %v2155_v6 }
 0x1c0   : > { %v761_v24 = vpop.permute.xlu1 %760  ;;  %v821_v36 = vrot.slane %v784_v33, %v2155_v6 }
 0x1c1   : > { %v759_v10 = vpop.permute.xlu0 %758  ;;  %v793_v58 = vmax.f32 %v2113_v1, %v761_v24 }
 0x1c2   : > { %1158 = vrot.lane.b32.xlu1 %v817_v47, %s1563_s25  ;;  %1156 = vrot.lane.b32.xlu0 %v813_v12, %s1563_s25  ;;  %v792_v23 = vmax.f32 %v2115_v0, %v759_v10 }
 0x1c3   : > { %v857_v40 = vrot.slane %v793_v58, %v2155_v6 }
 0x1c4   : > { %v853_v42 = vrot.slane %v792_v23, %v2155_v6 }
 0x1c6   : > { %1174 = vrot.lane.b32.xlu1 %v849_v59, %s1563_s25  ;;  %1172 = vrot.lane.b32.xlu0 %v845_v29, %s1563_s25 }
 0x1ca   : > { %920 = vrot.lane.b32.xlu1 %v825_v38, %s1562_s24  ;;  %918 = vrot.lane.b32.xlu0 %v821_v36, %s1562_s24 }
 0x1ce   : > { %936 = vrot.lane.b32.xlu1 %v857_v40, %s1562_s24  ;;  %934 = vrot.lane.b32.xlu0 %v853_v42, %s1562_s24 }
 0x1d2   : > { %1162 = vrot.lane.b32.xlu1 %v825_v38, %s1563_s25  ;;  %1160 = vrot.lane.b32.xlu0 %v821_v36, %s1563_s25 }
 0x1d6   : > { %1178 = vrot.lane.b32.xlu1 %v857_v40, %s1563_s25  ;;  %1176 = vrot.lane.b32.xlu0 %v853_v42, %s1563_s25 }
 0x1fc   : > { %v907_v1 = vpop.permute.xlu0 %906 }
 0x1fd   : > { %955 = vst.msk [vmem:[%s1730_s20] sm:$0xff] %vm954_vm2, %v907_v1  ;;  %956 = vst.msk [vmem:[%s1730_s20 + $0x8] sm:$0xff] %vm954_vm2, %v907_v1 }
 0x1fe   : > { %1116 = vst.msk [vmem:[%s1730_s20] sm:$0xff] %vm1115_vm3, %v2123_v5  ;;  %1117 = vst.msk [vmem:[%s1730_s20 + $0x8] sm:$0xff] %vm1115_vm3, %v2121_v46 }
 0x200   : > { %v923_v0 = vpop.permute.xlu0 %922 }
 0x201   : > { %971 = vst.msk [vmem:[%s1730_s20 + $0x80] sm:$0xff] %vm954_vm2, %v923_v0  ;;  %972 = vst.msk [vmem:[%s1730_s20 + $0x88] sm:$0xff] %vm954_vm2, %v923_v0 }
 0x202   : > { %1132 = vst.msk [vmem:[%s1730_s20 + $0x80] sm:$0xff] %vm1115_vm3, %v2127_v16  ;;  %1133 = vst.msk [vmem:[%s1730_s20 + $0x88] sm:$0xff] %vm1115_vm3, %v2125_v53 }
 0x204   : > { %v1149_v5 = vpop.permute.xlu0 %1148 }
 0x205   : > { %1197 = vst.msk [vmem:[%s1730_s20] sm:$0xff] %vm1196_vm4, %v1149_v5  ;;  %1198 = vst.msk [vmem:[%s1730_s20 + $0x8] sm:$0xff] %vm1196_vm4, %v1149_v5 }
 0x208   : > { %v1165_v46 = vpop.permute.xlu0 %1164 }
 0x209   : > { %1213 = vst.msk [vmem:[%s1730_s20 + $0x80] sm:$0xff] %vm1196_vm4, %v1165_v46  ;;  %1214 = vst.msk [vmem:[%s1730_s20 + $0x88] sm:$0xff] %vm1196_vm4, %v1165_v46 }
 0x20c   : > { %v909_v16 = vpop.permute.xlu1 %908 }
 0x20d   : > { %957 = vst.msk [vmem:[%s1730_s20 + $0x10] sm:$0xff] %vm954_vm2, %v909_v16  ;;  %958 = vst.msk [vmem:[%s1730_s20 + $0x18] sm:$0xff] %vm954_vm2, %v909_v16 }
 0x20e   : > { %1118 = vst.msk [vmem:[%s1730_s20 + $0x10] sm:$0xff] %vm1115_vm3, %v2131_v21  ;;  %1119 = vst.msk [vmem:[%s1730_s20 + $0x18] sm:$0xff] %vm1115_vm3, %v2129_v48 }
 0x20f   : > { %v911_v53 = vpop.permute.xlu0 %910 }
 0x210   : > { %959 = vst.msk [vmem:[%s1730_s20 + $0x20] sm:$0xff] %vm954_vm2, %v911_v53  ;;  %960 = vst.msk [vmem:[%s1730_s20 + $0x28] sm:$0xff] %vm954_vm2, %v911_v53  ;;  %v925_v6 = vpop.permute.xlu1 %924 }
 0x211   : > { %1120 = vst.msk [vmem:[%s1730_s20 + $0x20] sm:$0xff] %vm1115_vm3, %v2139_v20  ;;  %1121 = vst.msk [vmem:[%s1730_s20 + $0x28] sm:$0xff] %vm1115_vm3, %v2137_v54 }
 0x212   : > { %973 = vst.msk [vmem:[%s1730_s20 + $0x90] sm:$0xff] %vm954_vm2, %v925_v6  ;;  %974 = vst.msk [vmem:[%s1730_s20 + $0x98] sm:$0xff] %vm954_vm2, %v925_v6 }
 0x213   : > { %1134 = vst.msk [vmem:[%s1730_s20 + $0x90] sm:$0xff] %vm1115_vm3, %v2135_v62  ;;  %1135 = vst.msk [vmem:[%s1730_s20 + $0x98] sm:$0xff] %vm1115_vm3, %v2133_v52 }
 0x214   : > { %v1151_v48 = vpop.permute.xlu1 %1150 }
 0x215   : > { %1199 = vst.msk [vmem:[%s1730_s20 + $0x10] sm:$0xff] %vm1196_vm4, %v1151_v48  ;;  %1200 = vst.msk [vmem:[%s1730_s20 + $0x18] sm:$0xff] %vm1196_vm4, %v1151_v48 }
 0x218   : > { %v1167_v21 = vpop.permute.xlu1 %1166  ;;  %v927_v54 = vpop.permute.xlu0 %926 }
 0x219   : > { %1215 = vst.msk [vmem:[%s1730_s20 + $0x90] sm:$0xff] %vm1196_vm4, %v1167_v21  ;;  %1216 = vst.msk [vmem:[%s1730_s20 + $0x98] sm:$0xff] %vm1196_vm4, %v1167_v21 }
 0x21a   : > { %975 = vst.msk [vmem:[%s1730_s20 + $0xa0] sm:$0xff] %vm954_vm2, %v927_v54  ;;  %976 = vst.msk [vmem:[%s1730_s20 + $0xa8] sm:$0xff] %vm954_vm2, %v927_v54 }
 0x21b   : > { %1136 = vst.msk [vmem:[%s1730_s20 + $0xa0] sm:$0xff] %vm1115_vm3, %v2143_v31  ;;  %1137 = vst.msk [vmem:[%s1730_s20 + $0xa8] sm:$0xff] %vm1115_vm3, %v2141_v56 }
 0x21c   : > { %v913_v52 = vpop.permute.xlu1 %912  ;;  %v1153_v62 = vpop.permute.xlu0 %1152 }
 0x21d   : > { %961 = vst.msk [vmem:[%s1730_s20 + $0x30] sm:$0xff] %vm954_vm2, %v913_v52  ;;  %962 = vst.msk [vmem:[%s1730_s20 + $0x38] sm:$0xff] %vm954_vm2, %v913_v52 }
 0x21e   : > { %1201 = vst.msk [vmem:[%s1730_s20 + $0x20] sm:$0xff] %vm1196_vm4, %v1153_v62  ;;  %1202 = vst.msk [vmem:[%s1730_s20 + $0x28] sm:$0xff] %vm1196_vm4, %v1153_v62 }
 0x21f   : > { %1122 = vst.msk [vmem:[%s1730_s20 + $0x30] sm:$0xff] %vm1115_vm3, %v2147_v50  ;;  %1123 = vst.msk [vmem:[%s1730_s20 + $0x38] sm:$0xff] %vm1115_vm3, %v2145_v57 }
 0x220   : > { %v929_v20 = vpop.permute.xlu1 %928  ;;  %v1169_v56 = vpop.permute.xlu0 %1168 }
 0x221   : > { %977 = vst.msk [vmem:[%s1730_s20 + $0xb0] sm:$0xff] %vm954_vm2, %v929_v20  ;;  %978 = vst.msk [vmem:[%s1730_s20 + $0xb8] sm:$0xff] %vm954_vm2, %v929_v20 }
 0x222   : > { %1217 = vst.msk [vmem:[%s1730_s20 + $0xa0] sm:$0xff] %vm1196_vm4, %v1169_v56  ;;  %1218 = vst.msk [vmem:[%s1730_s20 + $0xa8] sm:$0xff] %vm1196_vm4, %v1169_v56 }
 0x223   : > { %1138 = vst.msk [vmem:[%s1730_s20 + $0xb0] sm:$0xff] %vm1115_vm3, %v2151_v3  ;;  %1139 = vst.msk [vmem:[%s1730_s20 + $0xb8] sm:$0xff] %vm1115_vm3, %v2149_v63 }
 0x224   : > { %v1155_v31 = vpop.permute.xlu1 %1154 }
 0x225   : > { %1203 = vst.msk [vmem:[%s1730_s20 + $0x30] sm:$0xff] %vm1196_vm4, %v1155_v31  ;;  %1204 = vst.msk [vmem:[%s1730_s20 + $0x38] sm:$0xff] %vm1196_vm4, %v1155_v31 }
 0x228   : > { %v1171_v57 = vpop.permute.xlu1 %1170 }
 0x229   : > { %1219 = vst.msk [vmem:[%s1730_s20 + $0xb0] sm:$0xff] %vm1196_vm4, %v1171_v57  ;;  %1220 = vst.msk [vmem:[%s1730_s20 + $0xb8] sm:$0xff] %vm1196_vm4, %v1171_v57 }
 0x22c   : > { %v917_v50 = vpop.permute.xlu1 %916  ;;  %v915_v3 = vpop.permute.xlu0 %914 }
 0x22d   : > { %965 = vst.msk [vmem:[%s1730_s20 + $0x50] sm:$0xff] %vm954_vm2, %v917_v50  ;;  %966 = vst.msk [vmem:[%s1730_s20 + $0x58] sm:$0xff] %vm954_vm2, %v917_v50 }
 0x22e   : > { %963 = vst.msk [vmem:[%s1730_s20 + $0x40] sm:$0xff] %vm954_vm2, %v915_v3  ;;  %964 = vst.msk [vmem:[%s1730_s20 + $0x48] sm:$0xff] %vm954_vm2, %v915_v3 }
 0x22f   : > { %1126 = vst.msk [vmem:[%s1730_s20 + $0x50] sm:$0xff] %vm1115_vm3, %v2179_v9  ;;  %1127 = vst.msk [vmem:[%s1730_s20 + $0x58] sm:$0xff] %vm1115_vm3, %v2167_v14 }
 0x230   : > { %1124 = vst.msk [vmem:[%s1730_s20 + $0x40] sm:$0xff] %vm1115_vm3, %v2164_v19  ;;  %1125 = vst.msk [vmem:[%s1730_s20 + $0x48] sm:$0xff] %vm1115_vm3, %v2153_v30  ;;  %v933_v63 = vpop.permute.xlu1 %932  ;;  %v931_v28 = vpop.permute.xlu0 %930 }
 0x231   : > { %981 = vst.msk [vmem:[%s1730_s20 + $0xd0] sm:$0xff] %vm954_vm2, %v933_v63  ;;  %982 = vst.msk [vmem:[%s1730_s20 + $0xd8] sm:$0xff] %vm954_vm2, %v933_v63 }
 0x232   : > { %979 = vst.msk [vmem:[%s1730_s20 + $0xc0] sm:$0xff] %vm954_vm2, %v931_v28  ;;  %980 = vst.msk [vmem:[%s1730_s20 + $0xc8] sm:$0xff] %vm954_vm2, %v931_v28 }
 0x233   : > { %1142 = vst.msk [vmem:[%s1730_s20 + $0xd0] sm:$0xff] %vm1115_vm3, %v2187_v45  ;;  %1143 = vst.msk [vmem:[%s1730_s20 + $0xd8] sm:$0xff] %vm1115_vm3, %v2172_v4 }
 0x234   : > { %1140 = vst.msk [vmem:[%s1730_s20 + $0xc0] sm:$0xff] %vm1115_vm3, %v2169_v61  ;;  %1141 = vst.msk [vmem:[%s1730_s20 + $0xc8] sm:$0xff] %vm1115_vm3, %v2159_v7  ;;  %v1159_v30 = vpop.permute.xlu1 %1158  ;;  %v1157_v19 = vpop.permute.xlu0 %1156 }
 0x235   : > { %1207 = vst.msk [vmem:[%s1730_s20 + $0x50] sm:$0xff] %vm1196_vm4, %v1159_v30  ;;  %1208 = vst.msk [vmem:[%s1730_s20 + $0x58] sm:$0xff] %vm1196_vm4, %v1159_v30 }
 0x236   : > { %1205 = vst.msk [vmem:[%s1730_s20 + $0x40] sm:$0xff] %vm1196_vm4, %v1157_v19  ;;  %1206 = vst.msk [vmem:[%s1730_s20 + $0x48] sm:$0xff] %vm1196_vm4, %v1157_v19 }
 0x238   : > { %v1175_v14 = vpop.permute.xlu1 %1174  ;;  %v1173_v61 = vpop.permute.xlu0 %1172 }
 0x239   : > { %1223 = vst.msk [vmem:[%s1730_s20 + $0xd0] sm:$0xff] %vm1196_vm4, %v1175_v14  ;;  %1224 = vst.msk [vmem:[%s1730_s20 + $0xd8] sm:$0xff] %vm1196_vm4, %v1175_v14 }
 0x23a   : > { %1221 = vst.msk [vmem:[%s1730_s20 + $0xc0] sm:$0xff] %vm1196_vm4, %v1173_v61  ;;  %1222 = vst.msk [vmem:[%s1730_s20 + $0xc8] sm:$0xff] %vm1196_vm4, %v1173_v61 }
 0x23c   : > { %v921_v7 = vpop.permute.xlu1 %920  ;;  %v919_v4 = vpop.permute.xlu0 %918 }
 0x23d   : > { %969 = vst.msk [vmem:[%s1730_s20 + $0x70] sm:$0xff] %vm954_vm2, %v921_v7  ;;  %970 = vst.msk [vmem:[%s1730_s20 + $0x78] sm:$0xff] %vm954_vm2, %v921_v7 }
 0x23e   : > { %967 = vst.msk [vmem:[%s1730_s20 + $0x60] sm:$0xff] %vm954_vm2, %v919_v4  ;;  %968 = vst.msk [vmem:[%s1730_s20 + $0x68] sm:$0xff] %vm954_vm2, %v919_v4 }
 0x23f   : > { %1130 = vst.msk [vmem:[%s1730_s20 + $0x70] sm:$0xff] %vm1115_vm3, %v2209_v2  ;;  %1131 = vst.msk [vmem:[%s1730_s20 + $0x78] sm:$0xff] %vm1115_vm3, %v2207_v37 }
 0x240   : > { %1128 = vst.msk [vmem:[%s1730_s20 + $0x60] sm:$0xff] %vm1115_vm3, %v2196_v34  ;;  %1129 = vst.msk [vmem:[%s1730_s20 + $0x68] sm:$0xff] %vm1115_vm3, %v2184_v25  ;;  %v937_v9 = vpop.permute.xlu1 %936  ;;  %v935_v45 = vpop.permute.xlu0 %934 }
 0x241   : > { %985 = vst.msk [vmem:[%s1730_s20 + $0xf0] sm:$0xff] %vm954_vm2, %v937_v9  ;;  %986 = vst.msk [vmem:[%s1730_s20 + $0xf8] sm:$0xff] %vm954_vm2, %v937_v9 }
 0x242   : > { %983 = vst.msk [vmem:[%s1730_s20 + $0xe0] sm:$0xff] %vm954_vm2, %v935_v45  ;;  %984 = vst.msk [vmem:[%s1730_s20 + $0xe8] sm:$0xff] %vm954_vm2, %v935_v45 }
 0x243   : > { %1146 = vst.msk [vmem:[%s1730_s20 + $0xf0] sm:$0xff] %vm1115_vm3, %v2215_v49  ;;  %1147 = vst.msk [vmem:[%s1730_s20 + $0xf8] sm:$0xff] %vm1115_vm3, %v2213_v13 }
 0x244   : > { %1144 = vst.msk [vmem:[%s1730_s20 + $0xe0] sm:$0xff] %vm1115_vm3, %v2202_v60  ;;  %1145 = vst.msk [vmem:[%s1730_s20 + $0xe8] sm:$0xff] %vm1115_vm3, %v2190_v26  ;;  %v1163_v25 = vpop.permute.xlu1 %1162  ;;  %v1161_v34 = vpop.permute.xlu0 %1160 }
 0x245   : > { %1211 = vst.msk [vmem:[%s1730_s20 + $0x70] sm:$0xff] %vm1196_vm4, %v1163_v25  ;;  %1212 = vst.msk [vmem:[%s1730_s20 + $0x78] sm:$0xff] %vm1196_vm4, %v1163_v25 }
 0x246   : > { %1209 = vst.msk [vmem:[%s1730_s20 + $0x60] sm:$0xff] %vm1196_vm4, %v1161_v34  ;;  %1210 = vst.msk [vmem:[%s1730_s20 + $0x68] sm:$0xff] %vm1196_vm4, %v1161_v34 }
 0x248   : > { %v1179_v26 = vpop.permute.xlu1 %1178  ;;  %v1177_v35 = vpop.permute.xlu0 %1176 }
 0x249   : > { %1227 = vst.msk [vmem:[%s1730_s20 + $0xf0] sm:$0xff] %vm1196_vm4, %v1179_v26  ;;  %1228 = vst.msk [vmem:[%s1730_s20 + $0xf8] sm:$0xff] %vm1196_vm4, %v1179_v26 }
 0x24a   : > { %1225 = vst.msk [vmem:[%s1730_s20 + $0xe0] sm:$0xff] %vm1196_vm4, %v1177_v35  ;;  %1226 = vst.msk [vmem:[%s1730_s20 + $0xe8] sm:$0xff] %vm1196_vm4, %v1177_v35 }
 0x24b   : > { %1511 = shalt.err (!%p1508_p3)
}
 0x24c   : > { %s1512_s8 = scalar_lea.hbm %s2472_s30, 4096  ;;  %s1516_s11 = scalar_lea.hbm %s2530_s3, 8192 }
 0x24d   : > { %p1513_p4 = scmp.ne.s32.totalorder %s2472_s30, %s1512_s8  ;;  %p1517_p9 = scmp.lt.u32.totalorder %s2472_s30, %s2530_s3 }
 0x24e   : > { %p1518_p10 = scmp.lt.u32.totalorder %s1516_s11, %s1512_s8  ;;  %p1520_p12 = scmp.lt.u32.totalorder %s1512_s8, %s2472_s30 }
 0x24f   : > { %p1514_p7 = pnand %p1513_p4, %p1625_p5 }
 0x250   : > { %p1519_p11 = por %p1518_p10, %p1517_p9 }
 0x251   : > { %p1515_p8 = pneg %p1514_p7 }
 0x252   : > { %p1521_p13 = por %p1520_p12, %p1519_p11 }
 0x254   : > { %p1522_p0 = pnand %p1521_p13, %p1515_p8 }
 0x256   : > { %1525 = shalt.err (!%p1522_p0)
}
 0x257   : > { %s1565_s20 = smov 128   ;;  %s1566_s24 = smov 8  }
 0x258   : > { %1455 = dma.vmem_to_hbm [thread:$0]  (%p1625_p5), %s2474_s27, 4096, %s2472_s30, %s2486_s16, %s1565_s20, %s1565_s20, %s1566_s24  }
 0x259 PF: > { %p1461_p1 = scmp.ge.s32.totalorder %s1560_s15, 2  ;;  %s1258_s25 = sand.u32 1, %s1548_s12  }
 0x25a   : > { %s1259_s26 = scalar_lea.sflag [#allocation3], %s1258_s25 }
 0x25b   : > { %p1458_p2 = pnand %p1461_p1, %p1629_p6 }
 0x25d   : > { %1543 = dma.done.wait (!%p1458_p2), %s1259_s26, 4096  }
 0x25e   : > { %1545 = vsyncadd (!%p1458_p2), %s1259_s26, 4294963200  ;;  %p13_p3 = scmp.ge.s32.totalorder %s1612_s18, 4   ;;  %s2533_s12 = smov %s1552_s13 }
 0x25f   : > { %s2534_s13 = smov %s1556_s14  ;;  %s2535_s14 = smov %s1623_s21 }
 0x260   : > { %s2536_s15 = smov %s1612_s18  ;;  %15 = sbr.rel (!%p13_p3) target bundleno = 3 (0x3), region = 67 }
 0x267   :  { %1264 = vsyncpa [#allocation3], 1 }
 0x268   :  { %1266 = vsyncpa [#allocation3 + $0x1], 1 }

</bundles_post_ra>
